<compile_context>
chip_gen: v7x
topology: tpu7x:2x2x1
jax: 0.10.0
libtpu: 0.0.40
codegen_flags: <defaults>
</compile_context>

<pallas_src>
import numpy as np
import jax
import jax.numpy as jnp
from jax.experimental import pallas as pl
from jax.experimental.pallas import tpu as pltpu

EPS = 1e-5
K3D, STRIDE, PAD = 4, 3, 1
C1, C2, C3 = 4, 8, 16          # conv output channels
D_IN = 16                      # input spatial size used in the test
K1 = 1 * K3D ** 3              # conv1 im2col K (in_channels=1)            64


def _conv_out(d):
    return (d + 2 * PAD - K3D) // STRIDE + 1


D1 = _conv_out(D_IN)           # 5
D2 = _conv_out(D1)             # 2
D3 = _conv_out(D2)             # 1
assert D3 == 1, "view(-1, 16) requires the final spatial dims to be 1x1x1"


# ----------------------------------------------------------------------------
# Layer-1 im2col (host side, transposed so the kernel input is lane-dense)
# ----------------------------------------------------------------------------
def extract_patches_t(x, k=K3D, s=STRIDE, p=PAD):
    """x: (N, 1, D, H, W) -> (k^3, N*Do*Ho*Wo); rows = taps (kd,kh,kw)."""
    N, C, D, H, W = x.shape
    assert C == 1, "conv1 has in_channels=1"
    xp = jnp.pad(x, ((0, 0), (0, 0), (p, p), (p, p), (p, p)))
    Do = (D + 2 * p - k) // s + 1
    Ho = (H + 2 * p - k) // s + 1
    Wo = (W + 2 * p - k) // s + 1
    cols = []
    for kd in range(k):
        for kh in range(k):
            for kw in range(k):
                cols.append(
                    xp[:, 0, kd:kd + s * Do:s, kh:kh + s * Ho:s, kw:kw + s * Wo:s])
    # (tap, N, Do, Ho, Wo) -> (tap, N*Do*Ho*Wo); column order (n, do, ho, wo)
    return jnp.stack(cols, axis=0).reshape(k * k * k, -1)


# ----------------------------------------------------------------------------
# Fused model builder
# ----------------------------------------------------------------------------
def make_simple_model(n_batch):
    M1 = n_batch * D1 ** 3             # conv1 output positions   (250 for N=2)
    M1P = ((M1 + 7) // 8) * 8          # sublane-aligned          (256)
    M2 = n_batch * D2 ** 3             # conv2 output positions   (16)
    M3 = n_batch * D3 ** 3             # conv3 output positions == N   (2)
    J2 = M2 * C2                       # flat layer-2 width       (128)
    J3 = M3 * C3                       # flat layer-3 width       (32)
    JO = n_batch * 2                   # flat logits width        (4)

    # -------- fused kernel ---------------------------------------------------
    def kernel(w1_ref, pt_ref, mask_ref, p1_ref, b2w_ref, q2_ref, p2_ref,
               b3w_ref, q3_ref, p3_ref, wf_ref, bf_ref, o_ref):
        f32 = jnp.float32

        def dot(a, b):
            return jnp.dot(a, b, preferred_element_type=f32)

        # ---- layer 1: channel-rows GEMM (4,64)@(64,256) -> (4,256),
        #      masked BN over the 250 true columns, ReLU.
        p1 = p1_ref[...]                              # (C1, 3) = [b1 | g1 | beta1]
        b1, g1, bt1 = p1[:, 0:1], p1[:, 1:2], p1[:, 2:3]
        mask = mask_ref[...]                          # (1, M1P), 1.0 for col < M1
        y1 = dot(w1_ref[...], pt_ref[...]) + b1       # (C1, M1P)
        inv_n1 = 1.0 / float(M1)
        mu1 = jnp.sum(y1 * mask, axis=1, keepdims=True) * inv_n1
        d1 = y1 - mu1
        var1 = jnp.sum(d1 * d1 * mask, axis=1, keepdims=True) * inv_n1
        a1 = jnp.maximum(d1 * jax.lax.rsqrt(var1 + EPS) * g1 + bt1, 0.0)

        # ---- layer 2: conv folded into dense B2; one (1,256)@(256,128) GEMM
        #      per input channel (padded a1 columns have zero coefficients).
        p2 = p2_ref[...]                              # (3, J2)
        y2 = p2[0:1, :]                               # bias, pre-broadcast
        for c in range(C1):
            y2 = y2 + dot(a1[c:c + 1, :], b2w_ref[c])
        # BN2: per-channel mean/var via the pooled-average matrix Q2.
        mu2 = dot(y2, q2_ref[...])
        d2 = y2 - mu2
        var2 = dot(d2 * d2, q2_ref[...])
        a2 = jnp.maximum(d2 * jax.lax.rsqrt(var2 + EPS) * p2[1:2, :] + p2[2:3, :],
                         0.0)                         # (1, J2)

        # ---- layer 3: single folded GEMM (1,128)@(128,32), BN via Q3, ReLU
        p3 = p3_ref[...]                              # (3, J3)
        y3 = p3[0:1, :] + dot(a2, b3w_ref[...])
        mu3 = dot(y3, q3_ref[...])
        d3 = y3 - mu3
        var3 = dot(d3 * d3, q3_ref[...])
        a3 = jnp.maximum(d3 * jax.lax.rsqrt(var3 + EPS) * p3[1:2, :] + p3[2:3, :],
                         0.0)                         # (1, J3)

        # ---- fc folded block-diagonally: the only HBM write of the forward
        o_ref[...] = dot(a3, wf_ref[...]) + bf_ref[...]

    def _fs(shape):
        return pl.BlockSpec(shape, lambda: (0,) * len(shape))

    fused = pl.pallas_call(
        kernel,
        out_shape=jax.ShapeDtypeStruct((1, JO), jnp.float32),
        in_specs=[
            _fs((C1, K1)),          # w1 (transposed, flattened)
            _fs((K1, M1P)),         # layer-1 im2col patches (transposed)
            _fs((1, M1P)),          # valid-column mask for BN1
            _fs((C1, 3)),           # [b1 | gamma1 | beta1]
            _fs((C1, M1P, J2)),     # folded layer-2 weights B2
            _fs((J2, J2)),          # per-channel averaging matrix Q2
            _fs((3, J2)),           # [b2; gamma2; beta2] pre-broadcast
            _fs((J2, J3)),          # folded layer-3 weights B3
            _fs((J3, J3)),          # per-channel averaging matrix Q3
            _fs((3, J3)),           # [b3; gamma3; beta3] pre-broadcast
            _fs((J3, JO)),          # block-diagonal fc weight
            _fs((1, JO)),           # fc bias (tiled per sample)
        ],
        out_specs=_fs((1, JO)),
        cost_estimate=pl.CostEstimate(flops=500_000, transcendentals=192,
                                      bytes_accessed=700_000),
        # Working set < 2 MiB; keep the request modest (v7x has 64 MiB VMEM).
        compiler_params=pltpu.CompilerParams(vmem_limit_bytes=16 * 1024 * 1024),
    )

    # -------- host-side one-time folding of static structure into weights ----
    def prepare_params(params):
        w1 = np.asarray(params["w1"], np.float32).reshape(C1, K1)
        w2 = np.asarray(params["w2"], np.float32)            # (C2, C1, 4,4,4)
        w3 = np.asarray(params["w3"], np.float32)            # (C3, C2, 4,4,4)
        wf = np.asarray(params["wf"], np.float32)            # (2, C3)

        # layer-2 fold: B2[cin, conv1_row, m*C2 + cout]
        b2w = np.zeros((C1, M1P, J2), np.float32)
        for kd in range(K3D):
            for kh in range(K3D):
                for kw in range(K3D):
                    wtap = w2[:, :, kd, kh, kw].T             # (C1, C2)
                    for n in range(n_batch):
                        for dd in range(D2):
                            d1 = dd * STRIDE - PAD + kd
                            if not (0 <= d1 < D1):
                                continue
                            for hh in range(D2):
                                h1 = hh * STRIDE - PAD + kh
                                if not (0 <= h1 < D1):
                                    continue
                                for ww in range(D2):
                                    w1p = ww * STRIDE - PAD + kw
                                    if not (0 <= w1p < D1):
                                        continue
                                    m = ((n * D2 + dd) * D2 + hh) * D2 + ww
                                    row = ((n * D1 + d1) * D1 + h1) * D1 + w1p
                                    b2w[:, row, m * C2:(m + 1) * C2] += wtap

        # layer-3 fold: B3[m2*C2 + cin, n*C3 + cout]  (output is 1x1x1)
        b3w = np.zeros((J2, J3), np.float32)
        for kd in range(K3D):
            d2 = kd - PAD
            if not (0 <= d2 < D2):
                continue
            for kh in range(K3D):
                h2 = kh - PAD
                if not (0 <= h2 < D2):
                    continue
                for kw in range(K3D):
                    w2p = kw - PAD
                    if not (0 <= w2p < D2):
                        continue
                    wtap = w3[:, :, kd, kh, kw].T             # (C2, C3)
                    for n in range(n_batch):
                        m2 = ((n * D2 + d2) * D2 + h2) * D2 + w2p
                        b3w[m2 * C2:(m2 + 1) * C2, n * C3:(n + 1) * C3] += wtap

        # per-channel averaging matrices (mean over batch*spatial per channel)
        ch2 = np.arange(J2) % C2
        q2 = (ch2[:, None] == ch2[None, :]).astype(np.float32) / M2
        ch3 = np.arange(J3) % C3
        q3 = (ch3[:, None] == ch3[None, :]).astype(np.float32) / M3

        # fc folded block-diagonally over the batch
        wff = np.zeros((J3, JO), np.float32)
        for n in range(n_batch):
            wff[n * C3:(n + 1) * C3, n * 2:(n + 1) * 2] = wf.T

        def nf(a):
            return np.asarray(a, np.float32)

        p1 = np.stack([nf(params["b1"]), nf(params["g1"]), nf(params["beta1"])],
                      axis=1)                                           # (C1, 3)
        p2 = np.stack([np.tile(nf(params["b2"]), M2),
                       np.tile(nf(params["g2"]), M2),
                       np.tile(nf(params["beta2"]), M2)])               # (3, J2)
        p3 = np.stack([np.tile(nf(params["b3"]), M3),
                       np.tile(nf(params["g3"]), M3),
                       np.tile(nf(params["beta3"]), M3)])               # (3, J3)
        bf = np.tile(nf(params["bf"]), n_batch).reshape(1, JO)
        mask = (np.arange(M1P) < M1).astype(np.float32).reshape(1, M1P)

        to = jnp.asarray
        return dict(w1=to(w1), mask=to(mask), p1=to(p1), b2w=to(b2w),
                    q2=to(q2), p2=to(p2), b3w=to(b3w), q3=to(q3), p3=to(p3),
                    wf=to(wff), bf=to(bf))

    @jax.jit
    def forward(x, kp):
        pt = extract_patches_t(x)                              # (64, M1)
        pt = jnp.pad(pt, ((0, 0), (0, M1P - M1)))              # lane padding
        outf = fused(kp["w1"], pt, kp["mask"], kp["p1"], kp["b2w"], kp["q2"],
                     kp["p2"], kp["b3w"], kp["q3"], kp["p3"], kp["wf"], kp["bf"])
        return outf.reshape(n_batch, 2)

    return prepare_params, forward


# ----------------------------------------------------------------------------
# Pure-JAX reference (correctness check only)
# ----------------------------------------------------------------------------
def ref_forward(x, params):
    def conv(x, w, b):
        y = jax.lax.conv_general_dilated(
            x, w, window_strides=(STRIDE,) * 3,
            padding=((PAD, PAD),) * 3,
            dimension_numbers=("NCDHW", "OIDHW", "NCDHW"))
        return y + b[None, :, None, None, None]

    def bn_relu(y, g, bt):
        mean = y.mean(axis=(0, 2, 3, 4), keepdims=True)
        var = ((y - mean) ** 2).mean(axis=(0, 2, 3, 4), keepdims=True)
        z = (y - mean) * jax.lax.rsqrt(var + EPS)
        z = z * g[None, :, None, None, None] + bt[None, :, None, None, None]
        return jnp.maximum(z, 0.0)

    x = bn_relu(conv(x, params["w1"], params["b1"]), params["g1"], params["beta1"])
    x = bn_relu(conv(x, params["w2"], params["b2"]), params["g2"], params["beta2"])
    x = bn_relu(conv(x, params["w3"], params["b3"]), params["g3"], params["beta3"])
    x = x.reshape(-1, 16)
    return x @ params["wf"].T + params["bf"]


# ----------------------------------------------------------------------------
def make_params(key):
    ks = jax.random.split(key, 12)

    def u(k, shape, scale):
        return jax.random.uniform(k, shape, jnp.float32, -1.0, 1.0) * scale

    return {
        "w1": u(ks[0], (4, 1, 4, 4, 4), 0.2),   "b1": u(ks[1], (4,), 0.1),
        "w2": u(ks[2], (8, 4, 4, 4, 4), 0.1),   "b2": u(ks[3], (8,), 0.1),
        "w3": u(ks[4], (16, 8, 4, 4, 4), 0.08), "b3": u(ks[5], (16,), 0.1),
        "wf": u(ks[6], (2, 16), 0.3),           "bf": u(ks[7], (2,), 0.1),
        "g1": 1.0 + u(ks[8], (4,), 0.1),   "beta1": u(ks[9], (4,), 0.1),
        "g2": 1.0 + u(ks[10], (8,), 0.1),  "beta2": u(ks[11], (8,), 0.1),
        "g3": jnp.ones((16,), jnp.float32),
        "beta3": jnp.zeros((16,), jnp.float32),
    }


if __name__ == "__main__":
    key = jax.random.PRNGKey(0)
    kx, kp = jax.random.split(key)
    N = 2
    # Input chosen so three stride-3 convs collapse spatial dims to 1x1x1,
    # making view(-1, 16) exactly the per-sample channel vector.
    x = jax.random.normal(kx, (N, 1, D_IN, D_IN, D_IN), dtype=jnp.float32)
    params = make_params(kp)

    prepare_params, forward = make_simple_model(N)
    kernel_params = prepare_params(params)

    out = jax.block_until_ready(forward(x, kernel_params))
    assert out.shape == (N, 2), out.shape

    ref = jax.block_until_ready(ref_forward(x, params))
    np.testing.assert_allclose(np.asarray(out), np.asarray(ref),
                               rtol=1e-3, atol=1e-3)

    print("KERNEL_OK")
</pallas_src>

<mosaic_0001>
module attributes {stable_mosaic.version = 11 : i64} {
  func.func @kernel(%arg0: memref<4x64xf32, #tpu.memory_space<vmem>>, %arg1: memref<64x256xf32, #tpu.memory_space<vmem>>, %arg2: memref<1x256xf32, #tpu.memory_space<vmem>>, %arg3: memref<4x3xf32, #tpu.memory_space<vmem>>, %arg4: memref<4x256x128xf32, #tpu.memory_space<vmem>>, %arg5: memref<128x128xf32, #tpu.memory_space<vmem>>, %arg6: memref<3x128xf32, #tpu.memory_space<vmem>>, %arg7: memref<128x32xf32, #tpu.memory_space<vmem>>, %arg8: memref<32x32xf32, #tpu.memory_space<vmem>>, %arg9: memref<3x32xf32, #tpu.memory_space<vmem>>, %arg10: memref<32x4xf32, #tpu.memory_space<vmem>>, %arg11: memref<1x4xf32, #tpu.memory_space<vmem>>, %arg12: memref<1x4xf32, #tpu.memory_space<vmem>>) attributes {dimension_semantics = [], scalar_prefetch = 0 : i64, scratch_operands = 0 : i64, tpu.core_type = #tpu.core_type<tc>} {
    %c0 = arith.constant 0 : index
    %c0_0 = arith.constant 0 : index
    %0 = vector.load %arg3[%c0, %c0_0] : memref<4x3xf32, #tpu.memory_space<vmem>>, vector<4x3xf32>
    %1 = vector.extract_strided_slice %0 {offsets = [0, 0], sizes = [4, 1], strides = [1, 1]} : vector<4x3xf32> to vector<4x1xf32>
    %2 = vector.extract_strided_slice %0 {offsets = [0, 1], sizes = [4, 1], strides = [1, 1]} : vector<4x3xf32> to vector<4x1xf32>
    %3 = vector.extract_strided_slice %0 {offsets = [0, 2], sizes = [4, 1], strides = [1, 1]} : vector<4x3xf32> to vector<4x1xf32>
    %c0_1 = arith.constant 0 : index
    %c0_2 = arith.constant 0 : index
    %4 = vector.load %arg2[%c0_1, %c0_2] : memref<1x256xf32, #tpu.memory_space<vmem>>, vector<1x256xf32>
    %c0_3 = arith.constant 0 : index
    %c0_4 = arith.constant 0 : index
    %5 = vector.load %arg0[%c0_3, %c0_4] : memref<4x64xf32, #tpu.memory_space<vmem>>, vector<4x64xf32>
    %c0_5 = arith.constant 0 : index
    %c0_6 = arith.constant 0 : index
    %6 = vector.load %arg1[%c0_5, %c0_6] : memref<64x256xf32, #tpu.memory_space<vmem>>, vector<64x256xf32>
    %cst = arith.constant dense<0.000000e+00> : vector<4x256xf32>
    %7 = tpu.matmul %5, %6, %cst {dimension_numbers = #tpu.dot_dimension_numbers<[1], [0], [0], [1], [0, 0, 1, 1], [], []>} : vector<4x64xf32>, vector<64x256xf32>, vector<4x256xf32> -> vector<4x256xf32>
    %8 = vector.broadcast %1 : vector<4x1xf32> to vector<4x256xf32>
    %9 = arith.addf %7, %8 : vector<4x256xf32>
    %10 = vector.broadcast %4 : vector<1x256xf32> to vector<4x256xf32>
    %11 = arith.mulf %9, %10 : vector<4x256xf32>
    %cst_7 = arith.constant dense<0.000000e+00> : vector<4xf32>
    %12 = vector.multi_reduction <add>, %11, %cst_7 [1] : vector<4x256xf32> to vector<4xf32>
    %13 = vector.shape_cast %12 : vector<4xf32> to vector<4x1xf32>
    %cst_8 = arith.constant 4.000000e-03 : f32
    %14 = vector.broadcast %cst_8 : f32 to vector<4x1xf32>
    %15 = arith.mulf %13, %14 : vector<4x1xf32>
    %16 = vector.broadcast %15 : vector<4x1xf32> to vector<4x256xf32>
    %17 = arith.subf %9, %16 : vector<4x256xf32>
    %18 = arith.mulf %17, %17 : vector<4x256xf32>
    %19 = vector.broadcast %4 : vector<1x256xf32> to vector<4x256xf32>
    %20 = arith.mulf %18, %19 : vector<4x256xf32>
    %cst_9 = arith.constant dense<0.000000e+00> : vector<4xf32>
    %21 = vector.multi_reduction <add>, %20, %cst_9 [1] : vector<4x256xf32> to vector<4xf32>
    %22 = vector.shape_cast %21 : vector<4xf32> to vector<4x1xf32>
    %cst_10 = arith.constant 4.000000e-03 : f32
    %23 = vector.broadcast %cst_10 : f32 to vector<4x1xf32>
    %24 = arith.mulf %22, %23 : vector<4x1xf32>
    %cst_11 = arith.constant 9.99999974E-6 : f32
    %25 = vector.broadcast %cst_11 : f32 to vector<4x1xf32>
    %26 = arith.addf %24, %25 : vector<4x1xf32>
    %27 = math.rsqrt %26 : vector<4x1xf32>
    %28 = vector.broadcast %27 : vector<4x1xf32> to vector<4x256xf32>
    %29 = arith.mulf %17, %28 : vector<4x256xf32>
    %30 = vector.broadcast %2 : vector<4x1xf32> to vector<4x256xf32>
    %31 = arith.mulf %29, %30 : vector<4x256xf32>
    %32 = vector.broadcast %3 : vector<4x1xf32> to vector<4x256xf32>
    %33 = arith.addf %31, %32 : vector<4x256xf32>
    %cst_12 = arith.constant 0.000000e+00 : f32
    %34 = vector.broadcast %cst_12 : f32 to vector<4x256xf32>
    %35 = arith.maximumf %33, %34 : vector<4x256xf32>
    %c0_13 = arith.constant 0 : index
    %c0_14 = arith.constant 0 : index
    %36 = vector.load %arg6[%c0_13, %c0_14] : memref<3x128xf32, #tpu.memory_space<vmem>>, vector<3x128xf32>
    %37 = vector.extract_strided_slice %36 {offsets = [0, 0], sizes = [1, 128], strides = [1, 1]} : vector<3x128xf32> to vector<1x128xf32>
    %38 = vector.extract_strided_slice %35 {offsets = [0, 0], sizes = [1, 256], strides = [1, 1]} : vector<4x256xf32> to vector<1x256xf32>
    %c0_15 = arith.constant 0 : index
    %c0_16 = arith.constant 0 : index
    %c0_17 = arith.constant 0 : index
    %39 = vector.load %arg4[%c0_15, %c0_16, %c0_17] : memref<4x256x128xf32, #tpu.memory_space<vmem>>, vector<1x256x128xf32>
    %40 = vector.shape_cast %39 : vector<1x256x128xf32> to vector<256x128xf32>
    %cst_18 = arith.constant dense<0.000000e+00> : vector<1x128xf32>
    %41 = tpu.matmul %38, %40, %cst_18 {dimension_numbers = #tpu.dot_dimension_numbers<[1], [0], [0], [1], [0, 0, 1, 1], [], []>} : vector<1x256xf32>, vector<256x128xf32>, vector<1x128xf32> -> vector<1x128xf32>
    %42 = arith.addf %37, %41 : vector<1x128xf32>
    %43 = vector.extract_strided_slice %35 {offsets = [1, 0], sizes = [1, 256], strides = [1, 1]} : vector<4x256xf32> to vector<1x256xf32>
    %c1 = arith.constant 1 : index
    %c0_19 = arith.constant 0 : index
    %c0_20 = arith.constant 0 : index
    %44 = vector.load %arg4[%c1, %c0_19, %c0_20] : memref<4x256x128xf32, #tpu.memory_space<vmem>>, vector<1x256x128xf32>
    %45 = vector.shape_cast %44 : vector<1x256x128xf32> to vector<256x128xf32>
    %cst_21 = arith.constant dense<0.000000e+00> : vector<1x128xf32>
    %46 = tpu.matmul %43, %45, %cst_21 {dimension_numbers = #tpu.dot_dimension_numbers<[1], [0], [0], [1], [0, 0, 1, 1], [], []>} : vector<1x256xf32>, vector<256x128xf32>, vector<1x128xf32> -> vector<1x128xf32>
    %47 = arith.addf %42, %46 : vector<1x128xf32>
    %48 = vector.extract_strided_slice %35 {offsets = [2, 0], sizes = [1, 256], strides = [1, 1]} : vector<4x256xf32> to vector<1x256xf32>
    %c2 = arith.constant 2 : index
    %c0_22 = arith.constant 0 : index
    %c0_23 = arith.constant 0 : index
    %49 = vector.load %arg4[%c2, %c0_22, %c0_23] : memref<4x256x128xf32, #tpu.memory_space<vmem>>, vector<1x256x128xf32>
    %50 = vector.shape_cast %49 : vector<1x256x128xf32> to vector<256x128xf32>
    %cst_24 = arith.constant dense<0.000000e+00> : vector<1x128xf32>
    %51 = tpu.matmul %48, %50, %cst_24 {dimension_numbers = #tpu.dot_dimension_numbers<[1], [0], [0], [1], [0, 0, 1, 1], [], []>} : vector<1x256xf32>, vector<256x128xf32>, vector<1x128xf32> -> vector<1x128xf32>
    %52 = arith.addf %47, %51 : vector<1x128xf32>
    %53 = vector.extract_strided_slice %35 {offsets = [3, 0], sizes = [1, 256], strides = [1, 1]} : vector<4x256xf32> to vector<1x256xf32>
    %c3 = arith.constant 3 : index
    %c0_25 = arith.constant 0 : index
    %c0_26 = arith.constant 0 : index
    %54 = vector.load %arg4[%c3, %c0_25, %c0_26] : memref<4x256x128xf32, #tpu.memory_space<vmem>>, vector<1x256x128xf32>
    %55 = vector.shape_cast %54 : vector<1x256x128xf32> to vector<256x128xf32>
    %cst_27 = arith.constant dense<0.000000e+00> : vector<1x128xf32>
    %56 = tpu.matmul %53, %55, %cst_27 {dimension_numbers = #tpu.dot_dimension_numbers<[1], [0], [0], [1], [0, 0, 1, 1], [], []>} : vector<1x256xf32>, vector<256x128xf32>, vector<1x128xf32> -> vector<1x128xf32>
    %57 = arith.addf %52, %56 : vector<1x128xf32>
    %c0_28 = arith.constant 0 : index
    %c0_29 = arith.constant 0 : index
    %58 = vector.load %arg5[%c0_28, %c0_29] : memref<128x128xf32, #tpu.memory_space<vmem>>, vector<128x128xf32>
    %cst_30 = arith.constant dense<0.000000e+00> : vector<1x128xf32>
    %59 = tpu.matmul %57, %58, %cst_30 {dimension_numbers = #tpu.dot_dimension_numbers<[1], [0], [0], [1], [0, 0, 1, 1], [], []>} : vector<1x128xf32>, vector<128x128xf32>, vector<1x128xf32> -> vector<1x128xf32>
    %60 = arith.subf %57, %59 : vector<1x128xf32>
    %61 = arith.mulf %60, %60 : vector<1x128xf32>
    %c0_31 = arith.constant 0 : index
    %c0_32 = arith.constant 0 : index
    %62 = vector.load %arg5[%c0_31, %c0_32] : memref<128x128xf32, #tpu.memory_space<vmem>>, vector<128x128xf32>
    %cst_33 = arith.constant dense<0.000000e+00> : vector<1x128xf32>
    %63 = tpu.matmul %61, %62, %cst_33 {dimension_numbers = #tpu.dot_dimension_numbers<[1], [0], [0], [1], [0, 0, 1, 1], [], []>} : vector<1x128xf32>, vector<128x128xf32>, vector<1x128xf32> -> vector<1x128xf32>
    %cst_34 = arith.constant 9.99999974E-6 : f32
    %64 = vector.broadcast %cst_34 : f32 to vector<1x128xf32>
    %65 = arith.addf %63, %64 : vector<1x128xf32>
    %66 = math.rsqrt %65 : vector<1x128xf32>
    %67 = arith.mulf %60, %66 : vector<1x128xf32>
    %68 = vector.extract_strided_slice %36 {offsets = [1, 0], sizes = [1, 128], strides = [1, 1]} : vector<3x128xf32> to vector<1x128xf32>
    %69 = arith.mulf %67, %68 : vector<1x128xf32>
    %70 = vector.extract_strided_slice %36 {offsets = [2, 0], sizes = [1, 128], strides = [1, 1]} : vector<3x128xf32> to vector<1x128xf32>
    %71 = arith.addf %69, %70 : vector<1x128xf32>
    %cst_35 = arith.constant 0.000000e+00 : f32
    %72 = vector.broadcast %cst_35 : f32 to vector<1x128xf32>
    %73 = arith.maximumf %71, %72 : vector<1x128xf32>
    %c0_36 = arith.constant 0 : index
    %c0_37 = arith.constant 0 : index
    %74 = vector.load %arg9[%c0_36, %c0_37] : memref<3x32xf32, #tpu.memory_space<vmem>>, vector<3x32xf32>
    %75 = vector.extract_strided_slice %74 {offsets = [0, 0], sizes = [1, 32], strides = [1, 1]} : vector<3x32xf32> to vector<1x32xf32>
    %c0_38 = arith.constant 0 : index
    %c0_39 = arith.constant 0 : index
    %76 = vector.load %arg7[%c0_38, %c0_39] : memref<128x32xf32, #tpu.memory_space<vmem>>, vector<128x32xf32>
    %cst_40 = arith.constant dense<0.000000e+00> : vector<1x32xf32>
    %77 = tpu.matmul %73, %76, %cst_40 {dimension_numbers = #tpu.dot_dimension_numbers<[1], [0], [0], [1], [0, 0, 1, 1], [], []>} : vector<1x128xf32>, vector<128x32xf32>, vector<1x32xf32> -> vector<1x32xf32>
    %78 = arith.addf %75, %77 : vector<1x32xf32>
    %c0_41 = arith.constant 0 : index
    %c0_42 = arith.constant 0 : index
    %79 = vector.load %arg8[%c0_41, %c0_42] : memref<32x32xf32, #tpu.memory_space<vmem>>, vector<32x32xf32>
    %cst_43 = arith.constant dense<0.000000e+00> : vector<1x32xf32>
    %80 = tpu.matmul %78, %79, %cst_43 {dimension_numbers = #tpu.dot_dimension_numbers<[1], [0], [0], [1], [0, 0, 1, 1], [], []>} : vector<1x32xf32>, vector<32x32xf32>, vector<1x32xf32> -> vector<1x32xf32>
    %81 = arith.subf %78, %80 : vector<1x32xf32>
    %82 = arith.mulf %81, %81 : vector<1x32xf32>
    %c0_44 = arith.constant 0 : index
    %c0_45 = arith.constant 0 : index
    %83 = vector.load %arg8[%c0_44, %c0_45] : memref<32x32xf32, #tpu.memory_space<vmem>>, vector<32x32xf32>
    %cst_46 = arith.constant dense<0.000000e+00> : vector<1x32xf32>
    %84 = tpu.matmul %82, %83, %cst_46 {dimension_numbers = #tpu.dot_dimension_numbers<[1], [0], [0], [1], [0, 0, 1, 1], [], []>} : vector<1x32xf32>, vector<32x32xf32>, vector<1x32xf32> -> vector<1x32xf32>
    %cst_47 = arith.constant 9.99999974E-6 : f32
    %85 = vector.broadcast %cst_47 : f32 to vector<1x32xf32>
    %86 = arith.addf %84, %85 : vector<1x32xf32>
    %87 = math.rsqrt %86 : vector<1x32xf32>
    %88 = arith.mulf %81, %87 : vector<1x32xf32>
    %89 = vector.extract_strided_slice %74 {offsets = [1, 0], sizes = [1, 32], strides = [1, 1]} : vector<3x32xf32> to vector<1x32xf32>
    %90 = arith.mulf %88, %89 : vector<1x32xf32>
    %91 = vector.extract_strided_slice %74 {offsets = [2, 0], sizes = [1, 32], strides = [1, 1]} : vector<3x32xf32> to vector<1x32xf32>
    %92 = arith.addf %90, %91 : vector<1x32xf32>
    %cst_48 = arith.constant 0.000000e+00 : f32
    %93 = vector.broadcast %cst_48 : f32 to vector<1x32xf32>
    %94 = arith.maximumf %92, %93 : vector<1x32xf32>
    %c0_49 = arith.constant 0 : index
    %c0_50 = arith.constant 0 : index
    %95 = vector.load %arg10[%c0_49, %c0_50] : memref<32x4xf32, #tpu.memory_space<vmem>>, vector<32x4xf32>
    %cst_51 = arith.constant dense<0.000000e+00> : vector<1x4xf32>
    %96 = tpu.matmul %94, %95, %cst_51 {dimension_numbers = #tpu.dot_dimension_numbers<[1], [0], [0], [1], [0, 0, 1, 1], [], []>} : vector<1x32xf32>, vector<32x4xf32>, vector<1x4xf32> -> vector<1x4xf32>
    %c0_52 = arith.constant 0 : index
    %c0_53 = arith.constant 0 : index
    %97 = vector.load %arg11[%c0_52, %c0_53] : memref<1x4xf32, #tpu.memory_space<vmem>>, vector<1x4xf32>
    %98 = arith.addf %96, %97 : vector<1x4xf32>
    %c0_54 = arith.constant 0 : index
    %c0_55 = arith.constant 0 : index
    %99 = vector.load %arg12[%c0_54, %c0_55] : memref<1x4xf32, #tpu.memory_space<vmem>>, vector<1x4xf32>
    tpu.vector_store %arg12[%c0_54, %c0_55], %98 {strides = array<i32>} : memref<1x4xf32, #tpu.memory_space<vmem>>, vector<1x4xf32>,
    return
  }
}

</mosaic_0001>

<bundles_post_ra>
// kernel: forward.1
= control target key start
LH: loop header
LB: loop body
LE: loop exit
PB: predicated region body
PF: predicated region fallthrough
CT: control target
= control target key end

     0   :  { %v1817_v3 = vmov 0.0   ;;  %v1818_v4 = vmov 0   ;;  %vm65_vm0 = vcmask 523264   ;;  %v1819_v28 = vmov 1   ;;  %s2537_s1 = inlined_call_operand.vmem [shape: f32[64,256], index: 1, kind: input, shape index: {}]   ;;  %s2538_s3 = inlined_call_operand.vmem [shape: f32[4,3], index: 3, kind: input, shape index: {}]   ;;  %s2539_s0 = inlined_call_operand.vmem [shape: f32[4,64], index: 0, kind: input, shape index: {}]   ;;  %s2540_s2 = inlined_call_operand.vmem [shape: f32[1,256], index: 2, kind: input, shape index: {}]   ;;  %s2541_s4 = inlined_call_operand.vmem [shape: f32[4,256,128], index: 4, kind: input, shape index: {}]   ;;  %s2542_s5 = inlined_call_operand.vmem [shape: f32[128,128], index: 5, kind: input, shape index: {}]   ;;  %s2543_s6 = inlined_call_operand.vmem [shape: f32[3,128], index: 6, kind: input, shape index: {}]   ;;  %s2544_s7 = inlined_call_operand.vmem [shape: f32[128,32], index: 7, kind: input, shape index: {}]   ;;  %s2545_s8 = inlined_call_operand.vmem [shape: f32[32,32], index: 8, kind: input, shape index: {}]   ;;  %s2546_s9 = inlined_call_operand.vmem [shape: f32[3,32], index: 9, kind: input, shape index: {}]   ;;  %s2547_s10 = inlined_call_operand.vmem [shape: f32[32,4], index: 10, kind: input, shape index: {}]   ;;  %s2548_s11 = inlined_call_operand.vmem [shape: f32[1,4], index: 11, kind: input, shape index: {}]   ;;  %s2549_s12 = inlined_call_operand.vmem [shape: f32[1,4], index: 12, kind: output, shape index: {}]  }
   0x1   :  { %v45_v0 = vld [vmem:[%s2537_s1 + $0x8] sm:$0xff]  ;;  %v47_v1 = vld [vmem:[%s2537_s1 + $0x18] sm:$0xff]  ;;  %v44_v2 = vld [vmem:[%s2537_s1] sm:$0xff]  ;;  %133 = vmatprep.mubr.f32.mxu0 %v1817_v3  ;;  %1807 = vset.pattern.permute.xlu0 %v1818_v4  ;;  %v141_v29 = vlaneseq  ;;  %vm153_vm1 = vcmask 1043456   ;;  %v1820_v46 = vmov 2   ;;  %vm1822_vm2 = vmmov 0  }
   0x2   :  { %v1567_v5 = vpack.c.bf16 %v47_v1, %v45_v0  ;;  %v46_v6 = vld [vmem:[%s2537_s1 + $0x10] sm:$0xff]  ;;  %v49_v7 = vld [vmem:[%s2537_s1 + $0x28] sm:$0xff]  ;;  %v51_v8 = vld [vmem:[%s2537_s1 + $0x38] sm:$0xff]  ;;  %1808 = vset.pattern.permute.xlu1 %v1819_v28  ;;  %vm880_vm3 = vcmask 261120   ;;  %vm1117_vm4 = vcmask 24576  }
   0x3   :  { %v1569_v9 = vpack.c.bf16 %v46_v6, %v44_v2  ;;  %v1571_v10 = vpack.c.bf16 %v51_v8, %v49_v7  ;;  %v48_v11 = vld [vmem:[%s2537_s1 + $0x20] sm:$0xff]  ;;  %v50_v12 = vld [vmem:[%s2537_s1 + $0x30] sm:$0xff]  ;;  %v53_v13 = vld [vmem:[%s2537_s1 + $0x48] sm:$0xff]  ;;  %v142_v30 = vshrl.u32 %v141_v29, 7 }
   0x4   :  { %1568 = vmatprep.subr.bf16.mxu0 %v1567_v5  ;;  %v55_v14 = vld [vmem:[%s2537_s1 + $0x58] sm:$0xff]  ;;  %v1573_v15 = vpack.c.bf16 %v50_v12, %v48_v11  ;;  %v52_v17 = vld [vmem:[%s2537_s1 + $0x40] sm:$0xff]  ;;  %v54_v18 = vld [vmem:[%s2537_s1 + $0x50] sm:$0xff] }
   0x5   :  { %1570 = vmatpush1.bf16.msra.mxu0 %v1569_v9  ;;  %v1575_v16 = vpack.c.bf16 %v55_v14, %v53_v13  ;;  %v1928_v19 = vld [vmem:[%s2538_s3] sm:$0xf]  ;;  %v57_v20 = vld [vmem:[%s2537_s1 + $0x68] sm:$0xff]  ;;  %v59_v21 = vld [vmem:[%s2537_s1 + $0x78] sm:$0xff]  ;;  %v1577_v22 = vpack.c.bf16 %v54_v18, %v52_v17  ;;  %v143_v31 = vsub.s32 0, %v142_v30  ;;  %v147_v33 = vsub.s32 1, %v142_v30 }
   0x6   :  { %1572 = vmatprep.subr.bf16.mxu0 %v1571_v10  ;;  %62 = vperm.xlu0 %1807, %v1928_v19   ;;  %v1579_v23 = vpack.c.bf16 %v59_v21, %v57_v20  ;;  %v56_v24 = vld [vmem:[%s2537_s1 + $0x60] sm:$0xff]  ;;  %v58_v25 = vld [vmem:[%s2537_s1 + $0x70] sm:$0xff]  ;;  %v208_v48 = vld [vmem:[%s2541_s4 + $0x88] sm:$0xff] }
   0x7   :  { %v1581_v26 = vpack.c.bf16 %v58_v25, %v56_v24  ;;  %v43_v27 = vld [vmem:[%s2539_s0] sm:$0xf]  ;;  %177 = vperm.xlu1 %1808, %v1928_v19   ;;  %v192_v51 = vld [vmem:[%s2541_s4 + $0x8] sm:$0xff]  ;;  %v209_v58 = vld [vmem:[%s2541_s4 + $0x90] sm:$0xff] }
   0x8   :  { %v42_v32 = vld [vmem:[%s2540_s2] sm:$0x3]  ;;  %v1141_v53 = vld [vmem:[%s2541_s4 + $0x188] sm:$0xff]  ;;  %v210_v60 = vld [vmem:[%s2541_s4 + $0x98] sm:$0xff] }
   0x9   :  { %1574 = vmatpush1.bf16.msra.mxu0 %v1573_v15  ;;  %v144_v35 = vrot.slane %v42_v32, %v143_v31  ;;  %v148_v37 = vrot.slane %v42_v32, %v147_v33  ;;  %v207_v47 = vld [vmem:[%s2541_s4 + $0x80] sm:$0xff]  ;;  %v1125_v57 = vld [vmem:[%s2541_s4 + $0x108] sm:$0xff]  ;;  %v193_v61 = vld [vmem:[%s2541_s4 + $0x10] sm:$0xff]  ;;  %v1587_v63 = vpack.c.bf16 %v210_v60, %v209_v58 }
   0xa   :  { %1576 = vmatprep.subr.bf16.mxu0 %v1575_v16  ;;  %1810 = vset.pattern.permute.xlu0 %v1820_v46  ;;  %v191_v49 = vld [vmem:[%s2541_s4] sm:$0xff]  ;;  %v1583_v50 = vpack.c.bf16 %v208_v48, %v207_v47  ;;  %v194_v62 = vld [vmem:[%s2541_s4 + $0x18] sm:$0xff]  ;;  %v1142_v1 = vld [vmem:[%s2541_s4 + $0x190] sm:$0xff] }
   0xb   :  { %1809 = vset.pattern.permute.xlu1 %v1820_v46  ;;  %v1140_v52 = vld [vmem:[%s2541_s4 + $0x180] sm:$0xff]  ;;  %v1585_v54 = vpack.c.bf16 %v192_v51, %v191_v49  ;;  %v1589_v0 = vpack.c.bf16 %v194_v62, %v193_v61  ;;  %v1143_v2 = vld [vmem:[%s2541_s4 + $0x198] sm:$0xff]  ;;  %v1126_v4 = vld [vmem:[%s2541_s4 + $0x110] sm:$0xff] }
   0xc   :  { %v1615_v55 = vpack.c.bf16 %v1141_v53, %v1140_v52  ;;  %v1124_v56 = vld [vmem:[%s2541_s4 + $0x100] sm:$0xff]  ;;  %1584 = vmatprep.subr.bf16.mxu1 %v1583_v50  ;;  %v1619_v5 = vpack.c.bf16 %v1143_v2, %v1142_v1  ;;  %v1127_v6 = vld [vmem:[%s2541_s4 + $0x118] sm:$0xff]  ;;  %v212_v8 = vld [vmem:[%s2541_s4 + $0xa8] sm:$0xff] }
   0xd   :  { %1578 = vmatpush1.bf16.msra.mxu0 %v1577_v22  ;;  %v1617_v59 = vpack.c.bf16 %v1125_v57, %v1124_v56  ;;  %1586 = vmatpush3.bf16.msra.mxu1 %v1585_v54  ;;  %v211_v7 = vld [vmem:[%s2541_s4 + $0xa0] sm:$0xff]  ;;  %v1621_v9 = vpack.c.bf16 %v1127_v6, %v1126_v4  ;;  %v196_v24 = vld [vmem:[%s2541_s4 + $0x28] sm:$0xff]  ;;  %v213_v32 = vld [vmem:[%s2541_s4 + $0xb0] sm:$0xff] }
   0xe   :  { %1580 = vmatprep.subr.bf16.mxu0 %v1579_v23  ;;  %1588 = vmatprep.subr.bf16.mxu1 %v1587_v63  ;;  %v1591_v10 = vpack.c.bf16 %v212_v8, %v211_v7  ;;  %v195_v23 = vld [vmem:[%s2541_s4 + $0x20] sm:$0xff]  ;;  %v1129_v30 = vld [vmem:[%s2541_s4 + $0x128] sm:$0xff]  ;;  %v214_v33 = vld [vmem:[%s2541_s4 + $0xb8] sm:$0xff] }
   0xf   :  { %v1593_v25 = vpack.c.bf16 %v196_v24, %v195_v23  ;;  %v1128_v29 = vld [vmem:[%s2541_s4 + $0x120] sm:$0xff]  ;;  %v200_v47 = vld [vmem:[%s2541_s4 + $0x48] sm:$0xff]  ;;  %v217_v54 = vld [vmem:[%s2541_s4 + $0xd0] sm:$0xff] }
  0x10   :  { %v1625_v31 = vpack.c.bf16 %v1129_v30, %v1128_v29  ;;  %v1148_v48 = vld [vmem:[%s2541_s4 + $0x1c0] sm:$0xff]  ;;  %v1149_v49 = vld [vmem:[%s2541_s4 + $0x1c8] sm:$0xff]  ;;  %v218_v56 = vld [vmem:[%s2541_s4 + $0xd8] sm:$0xff] }
  0x11   :  { %1582 = vmatpush1.bf16.msra.mxu0 %v1581_v26  ;;  %1590 = vmatpush3.bf16.msra.mxu1 %v1589_v0  ;;  %v1144_v26 = vld [vmem:[%s2541_s4 + $0x1a0] sm:$0xff]  ;;  %v1631_v51 = vpack.c.bf16 %v1149_v49, %v1148_v48  ;;  %v1133_v53 = vld [vmem:[%s2541_s4 + $0x148] sm:$0xff]  ;;  %v201_v57 = vld [vmem:[%s2541_s4 + $0x50] sm:$0xff] }
  0x12   :  { %1616 = vmatprep.subr.bf16.mxu0 %v1615_v55  ;;  %1592 = vmatprep.subr.bf16.mxu1 %v1591_v10  ;;  %v1132_v52 = vld [vmem:[%s2541_s4 + $0x140] sm:$0xff]  ;;  %v202_v58 = vld [vmem:[%s2541_s4 + $0x58] sm:$0xff]  ;;  %v1150_v61 = vld [vmem:[%s2541_s4 + $0x1d0] sm:$0xff] }
  0x13   :  { %v1633_v55 = vpack.c.bf16 %v1133_v53, %v1132_v52  ;;  %v1605_v60 = vpack.c.bf16 %v202_v58, %v201_v57  ;;  %v1151_v62 = vld [vmem:[%s2541_s4 + $0x1d8] sm:$0xff]  ;;  %v1134_v63 = vld [vmem:[%s2541_s4 + $0x150] sm:$0xff]  ;;  %v219_v2 = vld [vmem:[%s2541_s4 + $0xe0] sm:$0xff] }
  0x14   :  { %1123 = vmatmul.mubr.msk.f32.vlgmr.msra.gmra.mrb[0].mxu0 %vm65_vm0, %v43_v27  ;;  %v1145_v27 = vld [vmem:[%s2541_s4 + $0x1a8] sm:$0xff]  ;;  %v1635_v0 = vpack.c.bf16 %v1151_v62, %v1150_v61  ;;  %v1135_v1 = vld [vmem:[%s2541_s4 + $0x158] sm:$0xff]  ;;  %v203_v7 = vld [vmem:[%s2541_s4 + $0x60] sm:$0xff] }
  0x15   :  { %1618 = vmatpush3.bf16.msra.mxu0 %v1617_v59  ;;  %v1623_v28 = vpack.c.bf16 %v1145_v27, %v1144_v26  ;;  %1594 = vmatpush3.bf16.msra.mxu1 %v1593_v25  ;;  %v1603_v59 = vpack.c.bf16 %v218_v56, %v217_v54  ;;  %v220_v4 = vld [vmem:[%s2541_s4 + $0xe8] sm:$0xff]  ;;  %v206_v23 = vld [vmem:[%s2541_s4 + $0x78] sm:$0xff]  ;;  %v1154_v25 = vld [vmem:[%s2541_s4 + $0x1f0] sm:$0xff] }
  0x16   :  { %1620 = vmatprep.subr.bf16.mxu0 %v1619_v5  ;;  %v1637_v5 = vpack.c.bf16 %v1135_v1, %v1134_v63  ;;  %v1607_v6 = vpack.c.bf16 %v220_v4, %v219_v2  ;;  %v204_v8 = vld [vmem:[%s2541_s4 + $0x68] sm:$0xff]  ;;  %v1155_v26 = vld [vmem:[%s2541_s4 + $0x1f8] sm:$0xff]  ;;  %v1158_v58 = vld [vmem:[%s2541_s4 + $0x210] sm:$0xff] }
  0x17   :  { %v1153_v10 = vld [vmem:[%s2541_s4 + $0x1e8] sm:$0xff]  ;;  %v1643_v27 = vpack.c.bf16 %v1155_v26, %v1154_v25  ;;  %v1139_v29 = vld [vmem:[%s2541_s4 + $0x178] sm:$0xff]  ;;  %v1190_v4 = vld [vmem:[%s2541_s4 + $0x310] sm:$0xff] }
  0x18   :  { %v1207_v56 = vld [vmem:[%s2541_s4 + $0x398] sm:$0xff]  ;;  %v1177_v1 = vld [vmem:[%s2541_s4 + $0x2a8] sm:$0xff]  ;;  %v1162_v26 = vld [vmem:[%s2541_s4 + $0x230] sm:$0xff] }
  0x19   :  { %1622 = vmatpush3.bf16.msra.mxu0 %v1621_v9  ;;  %v1152_v9 = vld [vmem:[%s2541_s4 + $0x1e0] sm:$0xff] }
  0x1a   :  { %1624 = vmatprep.subr.bf16.mxu0 %v1623_v28  ;;  %v1138_v28 = vld [vmem:[%s2541_s4 + $0x170] sm:$0xff] }
  0x1b   :  { %v1645_v30 = vpack.c.bf16 %v1139_v29, %v1138_v28  ;;  %v1180_v29 = vld [vmem:[%s2541_s4 + $0x2c0] sm:$0xff] }
  0x1d   :  { %1626 = vmatpush3.bf16.msra.mxu0 %v1625_v31  ;;  %v1172_v31 = vld [vmem:[%s2541_s4 + $0x280] sm:$0xff] }
  0x85   :  { %v63_v34 = vpop.permute.xlu0 %62 }
  0xe7   :  { %v135_v36 = vpop.f32.mrb[0].mxu0 }
  0xe8   :  { %v136_v38 = vadd.f32 %v135_v36, %v63_v34  ;;  %v137_v39 = vpop.f32.mrb[1].mxu0  ;;  %v198_v36 = vld [vmem:[%s2541_s4 + $0x38] sm:$0xff] }
  0xe9   :  { %v138_v40 = vadd.f32 %v137_v39, %v63_v34  ;;  %v1595_v34 = vpack.c.bf16 %v214_v33, %v213_v32  ;;  %v1147_v39 = vld [vmem:[%s2541_s4 + $0x1b8] sm:$0xff]  ;;  %v1173_v32 = vld [vmem:[%s2541_s4 + $0x288] sm:$0xff] }
  0xea   :  { %v151_v41 = vmul.f32 %v144_v35, %v136_v38  ;;  %v1647_v33 = vpack.c.bf16 %v1173_v32, %v1172_v31  ;;  %v1194_v32 = vld [vmem:[%s2541_s4 + $0x330] sm:$0xff] }
  0xeb   :  { %v152_v42 = vmul.f32 %v148_v37, %v138_v40  ;;  %1596 = vmatprep.subr.bf16.mxu1 %v1595_v34  ;;  %v1204_v34 = vld [vmem:[%s2541_s4 + $0x380] sm:$0xff] }
  0xec   :  { %v154_v43 = vsel %vm153_vm1, %v151_v41, 0.0  ;;  %v1130_v41 = vld [vmem:[%s2541_s4 + $0x130] sm:$0xff] }
  0xed   :  { %v155_v44 = vsel %vm153_vm1, %v152_v42, 0.0  ;;  %v1131_v42 = vld [vmem:[%s2541_s4 + $0x138] sm:$0xff] }
  0xee   :  { %v156_v45 = vadd.f32 %v155_v44, %v154_v43  ;;  %v1629_v43 = vpack.c.bf16 %v1131_v42, %v1130_v41  ;;  %v215_v44 = vld [vmem:[%s2541_s4 + $0xc0] sm:$0xff] }
  0xf0   :  { %157 = vadd.xlane.f32.xlu0 %v156_v45  ;;  %v199_v45 = vld [vmem:[%s2541_s4 + $0x40] sm:$0xff] }
  0xf1   :  { %v1601_v50 = vpack.c.bf16 %v200_v47, %v199_v45  ;;  %v1157_v47 = vld [vmem:[%s2541_s4 + $0x208] sm:$0xff] }
 0x17d   :  { %v158_v11 = vpop.xlane.xlu0 %157 }
 0x17e   :  { %v159_v12 = vmul.f32 0.004, %v158_v11  ;;  %v1136_v11 = vld [vmem:[%s2541_s4 + $0x160] sm:$0xff] }
 0x180   :  { %v2006_v13 = vsub.f32 %v136_v38, %v159_v12  ;;  %v2008_v14 = vsub.f32 %v138_v40, %v159_v12  ;;  %v1146_v38 = vld [vmem:[%s2541_s4 + $0x1b0] sm:$0xff]  ;;  %v1137_v12 = vld [vmem:[%s2541_s4 + $0x168] sm:$0xff] }
 0x181   :  { %v1627_v40 = vpack.c.bf16 %v1147_v39, %v1146_v38 }
 0x182   :  { %v162_v15 = vmul.f32 %v2006_v13, %v2006_v13  ;;  %v163_v16 = vmul.f32 %v2008_v14, %v2008_v14 }
 0x183   :  { %1628 = vmatprep.subr.bf16.mxu0 %v1627_v40 }
 0x184   :  { %v164_v17 = vmul.f32 %v162_v15, %v144_v35  ;;  %v165_v18 = vmul.f32 %v163_v16, %v148_v37  ;;  %v197_v35 = vld [vmem:[%s2541_s4 + $0x30] sm:$0xff]  ;;  %1630 = vmatpush3.bf16.msra.mxu0 %v1629_v43  ;;  %v1609_v15 = vpack.c.bf16 %v204_v8, %v203_v7  ;;  %v1639_v16 = vpack.c.bf16 %v1153_v10, %v1152_v9  ;;  %v1208_v7 = vld [vmem:[%s2541_s4 + $0x3a0] sm:$0xff]  ;;  %v1209_v8 = vld [vmem:[%s2541_s4 + $0x3a8] sm:$0xff] }
 0x185   :  { %v1597_v37 = vpack.c.bf16 %v198_v36, %v197_v35  ;;  %1632 = vmatprep.subr.bf16.mxu0 %v1631_v51  ;;  %v1205_v35 = vld [vmem:[%s2541_s4 + $0x388] sm:$0xff]  ;;  %v1175_v51 = vld [vmem:[%s2541_s4 + $0x298] sm:$0xff] }
 0x186   :  { %v166_v20 = vsel %vm153_vm1, %v164_v17, 0.0  ;;  %v167_v21 = vsel %vm153_vm1, %v165_v18, 0.0  ;;  %v1641_v17 = vpack.c.bf16 %v1137_v12, %v1136_v11  ;;  %v221_v18 = vld [vmem:[%s2541_s4 + $0xf0] sm:$0xff]  ;;  %v1679_v36 = vpack.c.bf16 %v1205_v35, %v1204_v34  ;;  %v1160_v11 = vld [vmem:[%s2541_s4 + $0x220] sm:$0xff]  ;;  %v1161_v12 = vld [vmem:[%s2541_s4 + $0x228] sm:$0xff] }
 0x187   :  { %v168_v22 = vadd.f32 %v167_v21, %v166_v20  ;;  %1598 = vmatpush3.bf16.msra.mxu1 %v1597_v37  ;;  %v222_v20 = vld [vmem:[%s2541_s4 + $0xf8] sm:$0xff]  ;;  %v178_v37 = vpop.permute.xlu1 %177  ;;  %v1212_v35 = vld [vmem:[%s2541_s4 + $0x3c0] sm:$0xff] }
 0x188   :  { %1634 = vmatpush3.bf16.msra.mxu0 %v1633_v55  ;;  %v1611_v21 = vpack.c.bf16 %v222_v20, %v221_v18  ;;  %v1206_v55 = vld [vmem:[%s2541_s4 + $0x390] sm:$0xff]  ;;  %v1687_v18 = vpack.c.bf16 %v1209_v8, %v1208_v7  ;;  %v1192_v20 = vld [vmem:[%s2541_s4 + $0x320] sm:$0xff]  ;;  %v1219_v7 = vld [vmem:[%s2541_s4 + $0x3f8] sm:$0xff] }
 0x189   :  { %169 = vadd.xlane.f32.xlu1 %v168_v22  ;;  %1636 = vmatprep.subr.bf16.mxu0 %v1635_v0  ;;  %v205_v22 = vld [vmem:[%s2541_s4 + $0x70] sm:$0xff]  ;;  %v1176_v0 = vld [vmem:[%s2541_s4 + $0x2a0] sm:$0xff]  ;;  %v1683_v2 = vpack.c.bf16 %v1207_v56, %v1206_v55  ;;  %v1199_v55 = vld [vmem:[%s2541_s4 + $0x358] sm:$0xff] }
 0x18a   :  { %v1613_v24 = vpack.c.bf16 %v206_v23, %v205_v22  ;;  %v1655_v10 = vpack.c.bf16 %v1177_v1, %v1176_v0  ;;  %v1657_v22 = vpack.c.bf16 %v1161_v12, %v1160_v11  ;;  %v1210_v23 = vld [vmem:[%s2541_s4 + $0x3b0] sm:$0xff]  ;;  %v1187_v0 = vld [vmem:[%s2541_s4 + $0x2f8] sm:$0xff] }
 0x18c   :  { %1638 = vmatpush3.bf16.msra.mxu0 %v1637_v5  ;;  %v1191_v5 = vld [vmem:[%s2541_s4 + $0x318] sm:$0xff] }
 0x18d   :  { %1640 = vmatprep.subr.bf16.mxu0 %v1639_v16  ;;  %v1178_v16 = vld [vmem:[%s2541_s4 + $0x2b0] sm:$0xff] }
 0x190   :  { %1642 = vmatpush3.bf16.msra.mxu0 %v1641_v17  ;;  %v1179_v17 = vld [vmem:[%s2541_s4 + $0x2b8] sm:$0xff] }
 0x191   :  { %1644 = vmatprep.subr.bf16.mxu0 %v1643_v27  ;;  %v1659_v25 = vpack.c.bf16 %v1179_v17, %v1178_v16  ;;  %v1163_v27 = vld [vmem:[%s2541_s4 + $0x238] sm:$0xff] }
 0x192   :  { %v1661_v34 = vpack.c.bf16 %v1163_v27, %v1162_v26  ;;  %v1203_v16 = vld [vmem:[%s2541_s4 + $0x378] sm:$0xff] }
 0x194   :  { %1646 = vmatpush3.bf16.msra.mxu0 %v1645_v30  ;;  %v1181_v30 = vld [vmem:[%s2541_s4 + $0x2c8] sm:$0xff] }
 0x195   :  { %1680 = vmatprep.subr.bf16.mxu0 %v1679_v36  ;;  %v1213_v36 = vld [vmem:[%s2541_s4 + $0x3c8] sm:$0xff] }
 0x19a   :  { %183 = vperm.xlu1 %1809, %v1928_v19   ;;  %v216_v19 = vld [vmem:[%s2541_s4 + $0xc8] sm:$0xff] }
 0x19b   :  { %v1599_v46 = vpack.c.bf16 %v216_v19, %v215_v44 }
 0x19d   :  { %1600 = vmatprep.subr.bf16.mxu1 %v1599_v46  ;;  %v1156_v46 = vld [vmem:[%s2541_s4 + $0x200] sm:$0xff] }
 0x19e   :  { %1602 = vmatpush3.bf16.msra.mxu1 %v1601_v50  ;;  %v1188_v50 = vld [vmem:[%s2541_s4 + $0x300] sm:$0xff]  ;;  %v1649_v54 = vpack.c.bf16 %v1157_v47, %v1156_v46  ;;  %v1214_v46 = vld [vmem:[%s2541_s4 + $0x3d0] sm:$0xff]  ;;  %v1215_v47 = vld [vmem:[%s2541_s4 + $0x3d8] sm:$0xff] }
 0x19f   :  { %1604 = vmatprep.subr.bf16.mxu1 %v1603_v59  ;;  %v1159_v59 = vld [vmem:[%s2541_s4 + $0x218] sm:$0xff] }
 0x1a2   :  { %1606 = vmatpush3.bf16.msra.mxu1 %v1605_v60 }
 0x1a3   :  { %1608 = vmatprep.subr.bf16.mxu1 %v1607_v6  ;;  %v1653_v6 = vpack.c.bf16 %v1159_v59, %v1158_v58  ;;  %v1217_v58 = vld [vmem:[%s2541_s4 + $0x3e8] sm:$0xff] }
 0x1a6   :  { %1610 = vmatpush3.bf16.msra.mxu1 %v1609_v15  ;;  %v1685_v15 = vpack.c.bf16 %v1191_v5, %v1190_v4  ;;  %v1201_v4 = vld [vmem:[%s2541_s4 + $0x368] sm:$0xff] }
 0x1a7   :  { %1612 = vmatprep.subr.bf16.mxu1 %v1611_v21  ;;  %v1193_v21 = vld [vmem:[%s2541_s4 + $0x328] sm:$0xff] }
 0x1a8   :  { %v1689_v28 = vpack.c.bf16 %v1193_v21, %v1192_v20 }
 0x1aa   :  { %1614 = vmatpush3.bf16.msra.mxu1 %v1613_v24  ;;  %v1211_v24 = vld [vmem:[%s2541_s4 + $0x3b8] sm:$0xff] }
 0x1ab   :  { %1648 = vmatprep.subr.bf16.mxu1 %v1647_v33  ;;  %v1691_v31 = vpack.c.bf16 %v1211_v24, %v1210_v23  ;;  %v1195_v33 = vld [vmem:[%s2541_s4 + $0x338] sm:$0xff]  ;;  %v621_v23 = vld [vmem:[%s2542_s5 + $0x8] sm:$0xff]  ;;  %v622_v24 = vld [vmem:[%s2542_s5 + $0x10] sm:$0xff] }
 0x216   :  { %v170_v38 = vpop.xlane.xlu1 %169 }
 0x217   :  { %v171_v39 = vmul.f32 0.004, %v170_v38  ;;  %v1164_v38 = vld [vmem:[%s2541_s4 + $0x240] sm:$0xff] }
 0x219   :  { %v172_v40 = vadd.f32 1e-05, %v171_v39  ;;  %v1165_v39 = vld [vmem:[%s2541_s4 + $0x248] sm:$0xff] }
 0x21a   :  { %v184_v44 = vpop.permute.xlu1 %183 }
 0x21b   :  { %1811 = vrsqrt.f32 %v172_v40  ;;  %v1693_v40 = vpack.c.bf16 %v1195_v33, %v1194_v32  ;;  %v627_v32 = vld [vmem:[%s2542_s5 + $0x38] sm:$0xff] }
 0x225   :  { %v1812_v41 = vpop.eup %1811 }
 0x226   :  { %v174_v42 = vmul.f32 %v1812_v41, %v2006_v13  ;;  %v175_v43 = vmul.f32 %v1812_v41, %v2008_v14  ;;  %v1189_v13 = vld [vmem:[%s2541_s4 + $0x308] sm:$0xff]  ;;  %v1174_v14 = vld [vmem:[%s2541_s4 + $0x290] sm:$0xff] }
 0x227   :  { %v1681_v57 = vpack.c.bf16 %v1189_v13, %v1188_v50  ;;  %v1651_v63 = vpack.c.bf16 %v1175_v51, %v1174_v14  ;;  %v1182_v41 = vld [vmem:[%s2541_s4 + $0x2d0] sm:$0xff]  ;;  %v1167_v50 = vld [vmem:[%s2541_s4 + $0x258] sm:$0xff]  ;;  %v1184_v14 = vld [vmem:[%s2541_s4 + $0x2e0] sm:$0xff] }
 0x228   :  { %v180_v19 = vmul.f32 %v178_v37, %v174_v42  ;;  %v181_v45 = vmul.f32 %v178_v37, %v175_v43  ;;  %v1663_v37 = vpack.c.bf16 %v1181_v30, %v1180_v29  ;;  %v1183_v42 = vld [vmem:[%s2541_s4 + $0x2d8] sm:$0xff]  ;;  %v1695_v43 = vpack.c.bf16 %v1213_v36, %v1212_v35  ;;  %v1185_v51 = vld [vmem:[%s2541_s4 + $0x2e8] sm:$0xff] }
 0x229   :  { %v1671_v59 = vpack.c.bf16 %v1185_v51, %v1184_v14  ;;  %v625_v29 = vld [vmem:[%s2542_s5 + $0x28] sm:$0xff] }
 0x22a   :  { %v186_v48 = vadd.f32 %v184_v44, %v180_v19  ;;  %v187_v49 = vadd.f32 %v184_v44, %v181_v45  ;;  %v1196_v44 = vld [vmem:[%s2541_s4 + $0x340] sm:$0xff]  ;;  %v1197_v19 = vld [vmem:[%s2541_s4 + $0x348] sm:$0xff]  ;;  %v1665_v45 = vpack.c.bf16 %v1165_v39, %v1164_v38  ;;  %v631_v38 = vld [vmem:[%s2542_s5 + $0x58] sm:$0xff] }
 0x22b   :  { %v1697_v13 = vpack.c.bf16 %v1197_v19, %v1196_v44  ;;  %v629_v35 = vld [vmem:[%s2542_s5 + $0x48] sm:$0xff]  ;;  %v635_v44 = vld [vmem:[%s2542_s5 + $0x78] sm:$0xff] }
 0x22c   :  { %v2187_v52 = vmax.f32 %v186_v48, 0.0  ;;  %v189_v53 = vmax.f32 %v187_v49, 0.0  ;;  %v1667_v48 = vpack.c.bf16 %v1183_v42, %v1182_v41  ;;  %v1166_v49 = vld [vmem:[%s2541_s4 + $0x250] sm:$0xff]  ;;  %v633_v41 = vld [vmem:[%s2542_s5 + $0x68] sm:$0xff] }
 0x22d   :  { %v1669_v56 = vpack.c.bf16 %v1167_v50, %v1166_v49 }
 0x22e   :  { %287 = vmatprep.mubr.f32.mxu1 %v189_v53  ;;  %v330_v60 = vrot.slane %v189_v53, 1  ;;  %v438_v61 = vrot.slane %v189_v53, 2  ;;  %v329_v62 = vrot.slane %v2187_v52, 1  ;;  %v546_v9 = vrot.slane %v189_v53, 3 }
 0x22f   :  { %288 = vmatmul.mubr.f32.vlgmr.msra.gmra.mrb[0].mxu1 %v2187_v52  ;;  %v1699_v53 = vpack.c.bf16 %v1215_v47, %v1214_v46  ;;  %v437_v20 = vrot.slane %v2187_v52, 2  ;;  %v545_v21 = vrot.slane %v2187_v52, 3  ;;  %v623_v52 = vld [vmem:[%s2542_s5 + $0x18] sm:$0xff]  ;;  %v2428_v46 = vld [vmem:[%s2543_s6] sm:$0x7] }
 0x230   :  { %1650 = vmatpush3.bf16.msra.mxu1 %v1649_v54  ;;  %397 = vmatprep.mubr.f32.mxu0 %v330_v60  ;;  %v1198_v54 = vld [vmem:[%s2541_s4 + $0x350] sm:$0xff]  ;;  %v1168_v60 = vld [vmem:[%s2541_s4 + $0x260] sm:$0xff]  ;;  %v1715_v27 = vpack.c.bf16 %v623_v52, %v622_v24  ;;  %v802_v24 = vld [vmem:[%s2544_s7 + $0x68] sm:$0xff] }
 0x231   :  { %505 = vmatprep.mubr.f32.mxu1 %v438_v61  ;;  %398 = vmatmul.mubr.f32.vlgmr.msra.gmra.mrb[2].mxu0 %v329_v62  ;;  %v1169_v61 = vld [vmem:[%s2541_s4 + $0x268] sm:$0xff]  ;;  %v1701_v62 = vpack.c.bf16 %v1199_v55, %v1198_v54  ;;  %v803_v52 = vld [vmem:[%s2544_s7 + $0x70] sm:$0xff] }
 0x232   :  { %1682 = vmatpush3.bf16.msra.mxu0 %v1681_v57  ;;  %1652 = vmatprep.subr.bf16.mxu1 %v1651_v63  ;;  %v1216_v57 = vld [vmem:[%s2541_s4 + $0x3e0] sm:$0xff]  ;;  %v1186_v63 = vld [vmem:[%s2541_s4 + $0x2f0] sm:$0xff]  ;;  %v1673_v5 = vpack.c.bf16 %v1169_v61, %v1168_v60 }
 0x233   :  { %613 = vmatprep.mubr.f32.mxu0 %v546_v9  ;;  %1684 = vmatprep.subr.bf16.mxu0 %v1683_v2  ;;  %v1703_v1 = vpack.c.bf16 %v1217_v58, %v1216_v57  ;;  %v1200_v2 = vld [vmem:[%s2541_s4 + $0x360] sm:$0xff]  ;;  %v1675_v8 = vpack.c.bf16 %v1187_v0, %v1186_v63  ;;  %v1170_v9 = vld [vmem:[%s2541_s4 + $0x270] sm:$0xff] }
 0x234   :  { %1654 = vmatpush3.bf16.msra.mxu1 %v1653_v6  ;;  %v1218_v6 = vld [vmem:[%s2541_s4 + $0x3f0] sm:$0xff]  ;;  %v1705_v11 = vpack.c.bf16 %v1201_v4, %v1200_v2  ;;  %v789_v61 = vld [vmem:[%s2544_s7] sm:$0xff] }
 0x235   :  { %1656 = vmatprep.subr.bf16.mxu1 %v1655_v10  ;;  %v1171_v10 = vld [vmem:[%s2541_s4 + $0x278] sm:$0xff]  ;;  %v1707_v12 = vpack.c.bf16 %v1219_v7, %v1218_v6  ;;  %v791_v63 = vld [vmem:[%s2544_s7 + $0x10] sm:$0xff]  ;;  %v793_v4 = vld [vmem:[%s2544_s7 + $0x20] sm:$0xff] }
 0x236   :  { %1686 = vmatpush3.bf16.msra.mxu0 %v1685_v15  ;;  %v1202_v15 = vld [vmem:[%s2541_s4 + $0x370] sm:$0xff]  ;;  %v1677_v17 = vpack.c.bf16 %v1171_v10, %v1170_v9 }
 0x237   :  { %1688 = vmatprep.subr.bf16.mxu0 %v1687_v18  ;;  %v1709_v18 = vpack.c.bf16 %v1203_v16, %v1202_v15  ;;  %v797_v16 = vld [vmem:[%s2544_s7 + $0x40] sm:$0xff] }
 0x238   :  { %1658 = vmatpush3.bf16.msra.mxu1 %v1657_v22  ;;  %v620_v22 = vld [vmem:[%s2542_s5] sm:$0xff] }
 0x239   :  { %1660 = vmatprep.subr.bf16.mxu1 %v1659_v25  ;;  %v1821_v25 = vmov 0.0|0.0   ;;  %v1712_v26 = vpack.c.bf16 %v621_v23, %v620_v22  ;;  %v801_v23 = vld [vmem:[%s2544_s7 + $0x60] sm:$0xff] }
 0x23a   :  { %1690 = vmatpush3.bf16.msra.mxu0 %v1689_v28  ;;  %v624_v28 = vld [vmem:[%s2542_s5 + $0x20] sm:$0xff] }
 0x23b   :  { %1692 = vmatprep.subr.bf16.mxu0 %v1691_v31  ;;  %v1718_v30 = vpack.c.bf16 %v625_v29, %v624_v28  ;;  %v626_v31 = vld [vmem:[%s2542_s5 + $0x30] sm:$0xff]  ;;  %v876_v29 = vld [vmem:[%s2545_s8] sm:$0xff] }
 0x23c   :  { %1662 = vmatpush3.bf16.msra.mxu1 %v1661_v34  ;;  %v1721_v33 = vpack.c.bf16 %v627_v32, %v626_v31  ;;  %v628_v34 = vld [vmem:[%s2542_s5 + $0x40] sm:$0xff] }
 0x23d   :  { %1664 = vmatprep.subr.bf16.mxu1 %v1663_v37  ;;  %v1724_v36 = vpack.c.bf16 %v629_v35, %v628_v34  ;;  %v630_v37 = vld [vmem:[%s2542_s5 + $0x50] sm:$0xff]  ;;  %v781_v35 = vrot.slane %v2428_v46, 1 }
 0x23e   :  { %1694 = vmatpush3.bf16.msra.mxu0 %v1693_v40  ;;  %v1727_v39 = vpack.c.bf16 %v631_v38, %v630_v37  ;;  %v632_v40 = vld [vmem:[%s2542_s5 + $0x60] sm:$0xff]  ;;  %v784_v37 = vrot.slane %v2428_v46, 2 }
 0x23f   :  { %1696 = vmatprep.subr.bf16.mxu0 %v1695_v43  ;;  %v1730_v42 = vpack.c.bf16 %v633_v41, %v632_v40  ;;  %v634_v43 = vld [vmem:[%s2542_s5 + $0x70] sm:$0xff] }
 0x240   :  { %1666 = vmatpush3.bf16.msra.mxu1 %v1665_v45  ;;  %v1733_v19 = vpack.c.bf16 %v635_v44, %v634_v43  ;;  %v879_v43 = vld [vmem:[%s2545_s8 + $0x18] sm:$0xff] }
 0x241   :  { %1668 = vmatprep.subr.bf16.mxu1 %v1667_v48 }
 0x242   :  { %1698 = vmatpush3.bf16.msra.mxu0 %v1697_v13 }
 0x243   :  { %1700 = vmatprep.subr.bf16.mxu0 %v1699_v53 }
 0x244   :  { %1670 = vmatpush3.bf16.msra.mxu1 %v1669_v56 }
 0x245   :  { %1672 = vmatprep.subr.bf16.mxu1 %v1671_v59 }
 0x246   :  { %1702 = vmatpush3.bf16.msra.mxu0 %v1701_v62  ;;  %v790_v62 = vld [vmem:[%s2544_s7 + $0x8] sm:$0xff] }
 0x247   :  { %1704 = vmatprep.subr.bf16.mxu0 %v1703_v1  ;;  %v1760_v0 = vpack.c.bf16 %v790_v62, %v789_v61  ;;  %v792_v1 = vld [vmem:[%s2544_s7 + $0x18] sm:$0xff] }
 0x248   :  { %1674 = vmatpush3.bf16.msra.mxu1 %v1673_v5  ;;  %v1763_v2 = vpack.c.bf16 %v792_v1, %v791_v63  ;;  %v794_v5 = vld [vmem:[%s2544_s7 + $0x28] sm:$0xff]  ;;  %v1043_v1 = vld [vmem:[%s2548_s11] sm:$0x1] }
 0x249   :  { %1676 = vmatprep.subr.bf16.mxu1 %v1675_v8  ;;  %v1766_v6 = vpack.c.bf16 %v794_v5, %v793_v4 }
 0x24a   :  { %1706 = vmatpush3.bf16.msra.mxu0 %v1705_v11  ;;  %v795_v11 = vld [vmem:[%s2544_s7 + $0x30] sm:$0xff] }
 0x24b   :  { %1708 = vmatprep.subr.bf16.mxu0 %v1707_v12  ;;  %v796_v12 = vld [vmem:[%s2544_s7 + $0x38] sm:$0xff] }
 0x24c   :  { %1678 = vmatpush3.bf16.msra.mxu1 %v1677_v17  ;;  %v1769_v15 = vpack.c.bf16 %v796_v12, %v795_v11  ;;  %v798_v17 = vld [vmem:[%s2544_s7 + $0x48] sm:$0xff] }
 0x24d   :  { %1711 = vmatprep.subr.bf16.mxu1 %v1821_v25 }
 0x24e   :  { %1710 = vmatpush3.bf16.msra.mxu0 %v1709_v18  ;;  %v1772_v18 = vpack.c.bf16 %v798_v17, %v797_v16 }
 0x24f   :  { %506 = vmatmul.mubr.f32.vlgmr.msra.gmra.mrb[2].mxu1 %v437_v20  ;;  %1735 = vmatprep.subr.bf16.mxu0 %v1821_v25  ;;  %v799_v20 = vld [vmem:[%s2544_s7 + $0x50] sm:$0xff] }
 0x250   :  { %1713 = vmatpush3.bf16.msra.mxu1 %v1712_v26  ;;  %1461 = vmatprep.mubr.msk.f32.mxu1 %vm1822_vm2, %v1817_v3 }
 0x251   :  { %614 = vmatmul.mubr.f32.vlgmr.msra.gmra.mrb[4].mxu0 %v545_v21  ;;  %1714 = vmatprep.subr.bf16.mxu1 %v1821_v25  ;;  %v800_v21 = vld [vmem:[%s2544_s7 + $0x58] sm:$0xff] }
 0x252   :  { %1737 = vmatpush3.bf16.msra.mxu0 %v1712_v26  ;;  %1496 = vmatprep.mubr.msk.f32.mxu0 %vm1822_vm2, %v1817_v3  ;;  %v1775_v22 = vpack.c.bf16 %v800_v21, %v799_v20  ;;  %v1778_v26 = vpack.c.bf16 %v802_v24, %v801_v23 }
 0x253   :  { %1738 = vmatprep.subr.bf16.mxu0 %v1821_v25 }
 0x254   :  { %1716 = vmatpush3.bf16.msra.mxu1 %v1715_v27 }
 0x255   :  { %1717 = vmatprep.subr.bf16.mxu1 %v1821_v25 }
 0x256   :  { %1740 = vmatpush3.bf16.msra.mxu0 %v1715_v27  ;;  %v804_v27 = vld [vmem:[%s2544_s7 + $0x78] sm:$0xff] }
 0x257   :  { %1741 = vmatprep.subr.bf16.mxu0 %v1821_v25  ;;  %v1781_v28 = vpack.c.bf16 %v804_v27, %v803_v52 }
 0x258   :  { %1719 = vmatpush3.bf16.msra.mxu1 %v1718_v30 }
 0x259   :  { %1720 = vmatprep.subr.bf16.mxu1 %v1821_v25 }
 0x25a   :  { %1743 = vmatpush3.bf16.msra.mxu0 %v1718_v30  ;;  %v877_v30 = vld [vmem:[%s2545_s8 + $0x8] sm:$0xff] }
 0x25b   :  { %1744 = vmatprep.subr.bf16.mxu0 %v1821_v25  ;;  %v1784_v31 = vpack.c.bf16 %v877_v30, %v876_v29 }
 0x25c   :  { %1722 = vmatpush3.bf16.msra.mxu1 %v1721_v33 }
 0x25d   :  { %1723 = vmatprep.subr.bf16.mxu1 %v1821_v25 }
 0x25e   :  { %1746 = vmatpush3.bf16.msra.mxu0 %v1721_v33 }
 0x25f   :  { %1747 = vmatprep.subr.bf16.mxu0 %v1821_v25 }
 0x260   :  { %1725 = vmatpush3.bf16.msra.mxu1 %v1724_v36 }
 0x261   :  { %1726 = vmatprep.subr.bf16.mxu1 %v1821_v25 }
 0x262   :  { %1749 = vmatpush3.bf16.msra.mxu0 %v1724_v36 }
 0x263   :  { %1750 = vmatprep.subr.bf16.mxu0 %v1821_v25 }
 0x264   :  { %1728 = vmatpush3.bf16.msra.mxu1 %v1727_v39 }
 0x265   :  { %1729 = vmatprep.subr.bf16.mxu1 %v1821_v25 }
 0x266   :  { %1752 = vmatpush3.bf16.msra.mxu0 %v1727_v39 }
 0x267   :  { %1753 = vmatprep.subr.bf16.mxu0 %v1821_v25 }
 0x268   :  { %1731 = vmatpush3.bf16.msra.mxu1 %v1730_v42 }
 0x269   :  { %1732 = vmatprep.subr.bf16.mxu1 %v1821_v25 }
 0x26a   :  { %1755 = vmatpush3.bf16.msra.mxu0 %v1730_v42  ;;  %v878_v42 = vld [vmem:[%s2545_s8 + $0x10] sm:$0xff] }
 0x26b   :  { %1756 = vmatprep.subr.bf16.mxu0 %v1821_v25  ;;  %v1787_v44 = vpack.c.bf16 %v879_v43, %v878_v42 }
 0x26c   :  { %1734 = vmatpush3.bf16.msra.mxu1 %v1733_v19 }
 0x26d   :  { %1759 = vmatprep.subr.bf16.mxu1 %v1821_v25 }
 0x26e   :  { %1758 = vmatpush3.bf16.msra.mxu0 %v1733_v19  ;;  %v788_v19 = vld [vmem:[%s2546_s9] sm:$0x7] }
 0x26f   :  { %1783 = vmatprep.subr.bf16.mxu0 %v1821_v25  ;;  %v1035_v61 = vrot.slane %v788_v19, 2 }
 0x302   :  { %v1255_v45 = vpop.f32.mrb[0].mxu1 }
 0x303   :  { %v1256_v47 = vpop.f32.mrb[1].mxu1 }
 0x304   :  { %v1257_v48 = vadd.f32 %v1256_v47, %v1255_v45  ;;  %v1290_v49 = vpop.f32.mrb[2].mxu0 }
 0x305   :  { %v1291_v50 = vpop.f32.mrb[3].mxu0 }
 0x306   :  { %v293_v13 = vadd.f32 %v1257_v48, %v2428_v46  ;;  %v1292_v14 = vadd.f32 %v1291_v50, %v1290_v49 }
 0x308   :  { %v403_v51 = vadd.f32 %v1292_v14, %v293_v13  ;;  %v1039_v14 = vld [vmem:[%s2547_s10] sm:$0xff] }
 0x322   :  { %v1325_v53 = vpop.f32.mrb[2].mxu1 }
 0x323   :  { %v1326_v54 = vpop.f32.mrb[3].mxu1 }
 0x324   :  { %v1327_v55 = vadd.f32 %v1326_v54, %v1325_v53  ;;  %v1360_v56 = vpop.f32.mrb[4].mxu0  ;;  %v1041_v54 = vld [vmem:[%s2547_s10 + $0x10] sm:$0xff] }
 0x325   :  { %v1361_v57 = vpop.f32.mrb[5].mxu0 }
 0x326   :  { %v511_v58 = vadd.f32 %v1327_v55, %v403_v51  ;;  %v1362_v59 = vadd.f32 %v1361_v57, %v1360_v56  ;;  %v1040_v51 = vld [vmem:[%s2547_s10 + $0x8] sm:$0xff] }
 0x327   :  { %v1796_v53 = vpack.c.bf16 %v1040_v51, %v1039_v14 }
 0x328   :  { %v619_v60 = vadd.f32 %v1362_v59, %v511_v58  ;;  %v1032_v59 = vrot.slane %v788_v19, 1 }
 0x32a   :  { %1462 = vmatmul.mubr.f32.vlgmr.msra.gmra.mrb[4].mxu1 %v619_v60 }
 0x32b   :  { %1531 = vmatprep.mubr.msk.f32.mxu1 %vm1822_vm2, %v1817_v3  ;;  %1761 = vmatpush3.bf16.msra.mxu1 %v1760_v0 }
 0x32c   :  { %1762 = vmatprep.subr.bf16.mxu1 %v1821_v25 }
 0x32f   :  { %1764 = vmatpush3.bf16.msra.mxu1 %v1763_v2 }
 0x330   :  { %1765 = vmatprep.subr.bf16.mxu1 %v1821_v25 }
 0x333   :  { %1767 = vmatpush3.bf16.msra.mxu1 %v1766_v6 }
 0x334   :  { %1768 = vmatprep.subr.bf16.mxu1 %v1821_v25 }
 0x337   :  { %1770 = vmatpush3.bf16.msra.mxu1 %v1769_v15 }
 0x338   :  { %1771 = vmatprep.subr.bf16.mxu1 %v1821_v25 }
 0x33b   :  { %1773 = vmatpush3.bf16.msra.mxu1 %v1772_v18 }
 0x33c   :  { %1774 = vmatprep.subr.bf16.mxu1 %v1821_v25 }
 0x33f   :  { %1776 = vmatpush3.bf16.msra.mxu1 %v1775_v22 }
 0x340   :  { %1777 = vmatprep.subr.bf16.mxu1 %v1821_v25 }
 0x343   :  { %1779 = vmatpush3.bf16.msra.mxu1 %v1778_v26 }
 0x344   :  { %1780 = vmatprep.subr.bf16.mxu1 %v1821_v25 }
 0x347   :  { %1782 = vmatpush3.bf16.msra.mxu1 %v1781_v28 }
 0x3fd   :  { %v702_v7 = vpop.f32.mrb[4].mxu1 }
 0x3fe   :  { %v706_v8 = vsub.f32 %v619_v60, %v702_v7  ;;  %v1463_v9 = vpop.f32.mrb[5].mxu1 }
 0x400   :  { %v707_v10 = vmul.f32 %v706_v8, %v706_v8 }
 0x402   :  { %1497 = vmatmul.mubr.f32.vlgmr.msra.gmra.mrb[6].mxu0 %v707_v10 }
 0x403   :  { %1542 = vmatprep.mubr.msk.f32.mxu0 %vm1822_vm2, %v1817_v3  ;;  %1785 = vmatpush3.bf16.msra.mxu0 %v1784_v31 }
 0x404   :  { %1786 = vmatprep.subr.bf16.mxu0 %v1821_v25 }
 0x407   :  { %1788 = vmatpush3.bf16.msra.mxu0 %v1787_v44 }
 0x408   :  { %1789 = vmatprep.subr.bf16.mxu0 %v1821_v25 }
 0x4d5   :  { %v774_v32 = vpop.f32.mrb[6].mxu0 }
 0x4d6   :  { %v775_v33 = vadd.f32 1e-05, %v774_v32  ;;  %v1498_v34 = vpop.f32.mrb[7].mxu0 }
 0x4d8   :  { %1813 = vrsqrt.f32 %v775_v33 }
 0x4e2   :  { %v1814_v36 = vpop.eup %1813 }
 0x4e3   :  { %v779_v38 = vmul.f32 %v1814_v36, %v706_v8 }
 0x4e5   :  { %v783_v39 = vmul.f32 %v781_v35, %v779_v38 }
 0x4e7   :  { %v786_v40 = vadd.f32 %v784_v37, %v783_v39 }
 0x4e9   :  { %v787_v41 = vmax.f32 %v786_v40, 0.0 }
 0x4eb   :  { %1532 = vmatmul.mubr.f32.vlgmr.msra.gmra.mrb[6].mxu1 %v787_v41 }
 0x5be   :  { %v871_v45 = vpop.f32.mrb[6].mxu1 }
 0x5bf   :  { %v875_v46 = vadd.f32 %v871_v45, %v788_v19  ;;  %v1533_v47 = vpop.f32.mrb[7].mxu1 }
 0x5c1   :  { %1543 = vmatmul.mubr.msk.f32.vlgmr.msra.gmra.mrb[8].mxu0 %vm880_vm3, %v875_v46 }
 0x5c2   :  { %1791 = vmatpush3.bf16.msra.mxu0 %v1784_v31  ;;  %1553 = vmatprep.mubr.msk.f32.mxu0 %vm1822_vm2, %v1817_v3 }
 0x5c3   :  { %1792 = vmatprep.subr.bf16.mxu0 %v1821_v25 }
 0x5c6   :  { %1794 = vmatpush3.bf16.msra.mxu0 %v1787_v44 }
 0x5c7   :  { %1795 = vmatprep.subr.bf16.mxu0 %v1821_v25 }
 0x694   :  { %v950_v48 = vpop.f32.mrb[8].mxu0 }
 0x695   :  { %v954_v49 = vsub.f32 %v875_v46, %v950_v48  ;;  %v1544_v50 = vpop.f32.mrb[9].mxu0 }
 0x697   :  { %v955_v13 = vmul.f32 %v954_v49, %v954_v49 }
 0x699   :  { %1554 = vmatmul.mubr.msk.f32.vlgmr.msra.gmra.mrb[10].mxu0 %vm880_vm3, %v955_v13 }
 0x69a   :  { %1564 = vmatprep.mubr.msk.f32.mxu0 %vm1822_vm2, %v1817_v3  ;;  %1797 = vmatpush3.bf16.msra.mxu0 %v1796_v53  ;;  %v1042_v3 = vld [vmem:[%s2547_s10 + $0x18] sm:$0xff] }
 0x69b   :  { %1798 = vmatprep.subr.bf16.mxu0 %v1821_v25  ;;  %v1799_v55 = vpack.c.bf16 %v1042_v3, %v1041_v54 }
 0x69e   :  { %1800 = vmatpush3.bf16.msra.mxu0 %v1799_v55 }
 0x76c   :  { %v1025_v56 = vpop.f32.mrb[10].mxu0 }
 0x76d   :  { %v1026_v57 = vadd.f32 1e-05, %v1025_v56  ;;  %v1555_v58 = vpop.f32.mrb[11].mxu0 }
 0x76f   :  { %1815 = vrsqrt.f32 %v1026_v57 }
 0x779   :  { %v1816_v60 = vpop.eup %1815 }
 0x77a   :  { %v1030_v62 = vmul.f32 %v1816_v60, %v954_v49 }
 0x77c   :  { %v1034_v63 = vmul.f32 %v1032_v59, %v1030_v62 }
 0x77e   :  { %v1037_v25 = vadd.f32 %v1035_v61, %v1034_v63 }
 0x780   :  { %v1038_v0 = vmax.f32 %v1037_v25, 0.0 }
 0x782   :  { %1565 = vmatmul.mubr.msk.f32.vlgmr.msra.gmra.mrb[12].mxu0 %vm880_vm3, %v1038_v0 }
 0x855   :  { %v1113_v2 = vpop.f32.mrb[12].mxu0 }
 0x856   :  { %v1114_v4 = vadd.f32 %v1113_v2, %v1043_v1  ;;  %v1566_v5 = vpop.f32.mrb[13].mxu0 }
 0x858   :  { %1118 = vst.msk [vmem:[%s2549_s12] sm:$0x1] %vm1117_vm4, %v1114_v4 }

</bundles_post_ra>
